<compile_context>
chip_gen: v6e
topology: v6e:2x2x1
jax: 0.10.0
libtpu: 0.0.40
codegen_flags: <defaults>
</compile_context>

<pallas_src>
import jax
import jax.numpy as jnp
from jax.experimental import pallas as pl
from jax.experimental.pallas import tpu as pltpu


# ----------------------------------------------------------------------------
# Kernels
# ----------------------------------------------------------------------------
def _adapter_kernel_folded(x_ref, w_ref, b_ref, o_ref):
    """One (batch, L-tile) step, fully folded adapter.

    x_ref : (1, tL, C) input tile (I/O dtype)
    w_ref : (1, C, C)  per-batch folded weight  WA @ (scale*(w0*WB + w1*WD))
    b_ref : (1, 1, C)  per-batch folded bias (all conv biases + gate + scale)
    o_ref : (1, tL, C) output tile (I/O dtype)
    """
    x = x_ref[0]                                                    # (tL, C)
    y = jnp.dot(x.astype(w_ref.dtype), w_ref[0],
                preferred_element_type=jnp.float32)                 # (tL, C) f32
    # Residual add in the output dtype: avoids holding an extra f32 (tL, C)
    # slab (identical result for f32 I/O, <=1 ulp of bf16 for bf16 I/O).
    o_ref[0] = (y + b_ref[0]).astype(o_ref.dtype) + x


def _adapter_kernel_factored(x_ref, wa_ref, wc_ref, bc_ref, o_ref):
    """Factored variant (kept for very wide C where the fold's extra FLOPs
    could stop being free):  out = (x @ WA) @ Wc[b] + bc[b] + x."""
    x = x_ref[0]                                                    # (tL, C)
    h = jnp.dot(x.astype(wa_ref.dtype), wa_ref[...],
                preferred_element_type=jnp.float32)                 # (tL, H)
    y = jnp.dot(h.astype(wc_ref.dtype), wc_ref[0],
                preferred_element_type=jnp.float32)                 # (tL, C)
    o_ref[0] = (y + bc_ref[0]).astype(o_ref.dtype) + x


# ----------------------------------------------------------------------------
# Generation-aware tiling / VMEM budget
# ----------------------------------------------------------------------------
def _vmem_capacity_bytes():
    try:
        cap = getattr(pltpu.get_tpu_info(), "vmem_capacity_bytes", None)
        if cap:
            return int(cap)
    except Exception:
        pass
    return 64 * 1024 * 1024            # conservative: v7x per-TC physical VMEM


def _vmem_limit_bytes(vmem_cap):
    # Never request the whole physical VMEM (v7x = 64 MiB/TC); keep 64 MiB
    # where physical VMEM is 128 MiB (v5e / v6e).
    return int(min(int(0.75 * vmem_cap), 64 * 1024 * 1024))


def _pick_tile_l(L, C, io_itemsize, weight_bytes, vmem_limit):
    """Largest L tile (multiple of 8, or == L) whose pipeline footprint —
    double-buffered in+out tiles plus ~2 live f32 (tile_l, C) temps plus the
    double-buffered per-batch weights — stays within half the VMEM limit
    (2x headroom so it compiles on every generation)."""
    per_row = 4 * C * io_itemsize + 2 * 4 * C
    budget = max(per_row * 8, vmem_limit - 2 * weight_bytes)
    max_rows = max(8, (budget // 2) // per_row)
    max_rows = (max_rows // 8) * 8
    return L if L <= max_rows else int(max_rows)


# ----------------------------------------------------------------------------
# Wrapper
# ----------------------------------------------------------------------------
def pia_adapter_ffn(x, params, *, scale=1.0, t=10.0, x_mean=None,
                    tile_l=None, mxu_dtype=None, fold_hidden=None,
                    donate_x=False):
    """x: (B, L, C). Returns (B, L, C) in x.dtype (eval-mode forward)."""
    B, L, C = x.shape
    H = params["conv_A_w"].shape[1]

    # MXU operand dtype: follow the I/O dtype.  The kernel is HBM-bound, so
    # f32 MXU passes are hidden for f32 callers (full accuracy); bf16 callers
    # get bf16 operands for free.
    if mxu_dtype is None:
        mxu_dtype = jnp.bfloat16 if x.dtype == jnp.bfloat16 else jnp.float32

    # ---- gating (eval-mode, start_pos=True): tiny (B,C)@(C,2), host glue.
    if x_mean is None:
        # TODO(synk): when start_pos=False the PyTorch module reuses cached
        # self.weights; pass x_mean (from the producer of x, or cached) here
        # to avoid this second full HBM read of x.
        x_mean = jnp.mean(x, axis=1, dtype=jnp.float32)             # f32 accumulate
    gate = jax.nn.softmax(
        (x_mean.astype(jnp.float32) @ params["expert_w"].T.astype(jnp.float32))
        / t, axis=-1)                                               # (B, 2) f32

    # ---- fold gate + scale + all biases into per-batch H->C weight / bias.
    WA = params["conv_A_w"].astype(jnp.float32)                     # (C, H)
    WB = params["conv_B_bd"].astype(jnp.float32)                    # (H, C)
    WD = params["conv_D_bd"].astype(jnp.float32)                    # (H, C)
    bA = params["conv_A_b"].astype(jnp.float32)                     # (H,)
    bB = params["conv_B_b"].astype(jnp.float32)                     # (C,)
    bD = params["conv_D_b"].astype(jnp.float32)                     # (C,)

    w0 = gate[:, 0][:, None, None]
    w1 = gate[:, 1][:, None, None]
    Wc = scale * (w0 * WB[None] + w1 * WD[None])                    # (B, H, C)
    bc = (scale * (gate[:, 0:1] * bB[None, :] + gate[:, 1:2] * bD[None, :])
          + jnp.einsum("h,bhc->bc", bA, Wc))[:, None, :]            # (B, 1, C) f32

    if fold_hidden is None:
        # Folding WA into Wc makes the kernel a single (tL,C)@(C,C) matmul; the
        # C/(2H) flop growth is hidden while HBM-bound (moderate C on all
        # generations).  Keep the factored 2-matmul form for very wide C
        # (e.g. v5e + bf16 I/O at C >= 768).
        fold_hidden = C <= 512

    # ---- tiling / VMEM budget (generation-aware).
    vmem_cap = _vmem_capacity_bytes()
    vmem_limit = _vmem_limit_bytes(vmem_cap)
    io_item = jnp.dtype(x.dtype).itemsize
    w_item = jnp.dtype(mxu_dtype).itemsize
    weight_bytes = (C * C if fold_hidden else C * H + H * C) * w_item + C * 4
    if tile_l is None:
        tile_l = _pick_tile_l(L, C, io_item, weight_bytes, vmem_limit)
    assert tile_l == L or tile_l % 8 == 0, "(8,*) sublane constraint on tile_l"
    # NOTE: lane-dense (unmasked) stores want C % 128 == 0 (true for the
    # module's default in_features=768 and the demo's 128).

    grid = (B, pl.cdiv(L, tile_l))      # tail block masked by Pallas if ragged
    x_spec = pl.BlockSpec((1, tile_l, C), lambda b, l: (b, l, 0))
    out_spec = pl.BlockSpec((1, tile_l, C), lambda b, l: (b, l, 0))
    cparams = pltpu.CompilerParams(
        dimension_semantics=("parallel", "parallel"),
        vmem_limit_bytes=vmem_limit)
    io_alias = {0: 0} if donate_x else {}   # safe: identical in/out index maps

    if fold_hidden:
        Wfull = jnp.einsum("ch,bhk->bck", WA, Wc).astype(mxu_dtype)  # (B, C, C)
        return pl.pallas_call(
            _adapter_kernel_folded,
            out_shape=jax.ShapeDtypeStruct((B, L, C), x.dtype),
            grid=grid,
            in_specs=[
                x_spec,
                pl.BlockSpec((1, C, C), lambda b, l: (b, 0, 0)),     # Wfull
                pl.BlockSpec((1, 1, C), lambda b, l: (b, 0, 0)),     # bias f32
            ],
            out_specs=out_spec,
            compiler_params=cparams,
            input_output_aliases=io_alias,
        )(x, Wfull, bc)

    wa = WA.astype(mxu_dtype)                                        # (C, H)
    Wc_k = Wc.astype(mxu_dtype)                                      # (B, H, C)
    return pl.pallas_call(
        _adapter_kernel_factored,
        out_shape=jax.ShapeDtypeStruct((B, L, C), x.dtype),
        grid=grid,
        in_specs=[
            x_spec,
            pl.BlockSpec((C, H), lambda b, l: (0, 0)),               # WA
            pl.BlockSpec((1, H, C), lambda b, l: (b, 0, 0)),         # Wc
            pl.BlockSpec((1, 1, C), lambda b, l: (b, 0, 0)),         # bias f32
        ],
        out_specs=out_spec,
        compiler_params=cparams,
        input_output_aliases=io_alias,
    )(x, wa, Wc_k, bc)


# ----------------------------------------------------------------------------
# Parameter construction + pure-JAX reference
# ----------------------------------------------------------------------------
def _block_diag_from_groups(wg):
    """wg: (g, Hg, Cg) per-group weights -> (g*Hg, g*Cg) block-diagonal."""
    g, Hg, Cg = wg.shape
    W = jnp.zeros((g * Hg, g * Cg), wg.dtype)
    for i in range(g):
        W = W.at[i * Hg:(i + 1) * Hg, i * Cg:(i + 1) * Cg].set(wg[i])
    return W


def make_params(key, in_features, hidden_dim, groups):
    """Shapes follow the PyTorch module:
      conv_A: Conv1d(C, H, 1)          weight (H, C, 1) -> stored (C, H)
      conv_B: Conv1d(H, C, 1, groups)  weight (C, H/g, 1) -> block-diag (H, C)
      conv_D: same as conv_B
      expert_weights: Linear(C, 2, bias=False) -> weight (2, C)
    NOTE: PyTorch zero-inits conv_B/conv_D (identity adapter); small random
    values are used here so the kernel path is actually exercised."""
    C, H, g = in_features, hidden_dim, groups
    Hg, Cg = H // g, C // g
    k = jax.random.split(key, 6)

    bound = (6.0 / (C + H)) ** 0.5                                   # xavier_uniform
    wa = jax.random.uniform(k[0], (C, H), jnp.float32, -bound, bound)
    ba = jnp.zeros((H,), jnp.float32)

    wb_g = 0.02 * jax.random.normal(k[1], (g, Hg, Cg), jnp.float32)
    bb = 0.01 * jax.random.normal(k[2], (C,), jnp.float32)
    wd_g = 0.02 * jax.random.normal(k[3], (g, Hg, Cg), jnp.float32)
    bd = 0.01 * jax.random.normal(k[4], (C,), jnp.float32)

    we = 0.05 * jax.random.normal(k[5], (2, C), jnp.float32)

    return {
        "conv_A_w": wa, "conv_A_b": ba,
        "conv_B_bd": _block_diag_from_groups(wb_g), "conv_B_b": bb,
        "conv_D_bd": _block_diag_from_groups(wd_g), "conv_D_b": bd,
        "expert_w": we,
    }


def reference(x, params, scale, t):
    """Pure-JAX f32 reference of the eval-mode forward pass."""
    xf = x.astype(jnp.float32)
    gate = jax.nn.softmax((jnp.mean(xf, axis=1) @ params["expert_w"].T) / t, -1)
    h = xf @ params["conv_A_w"] + params["conv_A_b"]
    yb = h @ params["conv_B_bd"] + params["conv_B_b"]
    yd = h @ params["conv_D_bd"] + params["conv_D_b"]
    return (yb * gate[:, None, 0:1] + yd * gate[:, None, 1:2]) * scale + xf


# ----------------------------------------------------------------------------
# Demo / checks
# ----------------------------------------------------------------------------
if __name__ == "__main__":
    B, L = 2, 16
    in_features, hidden_dim, groups = 128, 8, 2      # C=128 -> lane-dense stores
    scale, t = 1.0, 10.0

    key = jax.random.PRNGKey(0)
    kx, km, kp = jax.random.split(key, 3)
    x = jax.random.normal(kx, (B, L, in_features), jnp.float32)
    # question_mask is only consumed in the training branch; built for shape
    # completeness, unused in the eval-mode forward implemented here.
    question_mask = (jax.random.uniform(km, (B, L)) > 0.5).astype(jnp.float32)

    params = make_params(kp, in_features, hidden_dim, groups)
    ref = reference(x, params, scale, t)

    # 1) f32 I/O, folded single-matmul kernel (f32 MXU operands -> tight tol).
    out = jax.block_until_ready(pia_adapter_ffn(x, params, scale=scale, t=t))
    assert out.shape == (B, L, in_features) and out.dtype == x.dtype
    assert jnp.allclose(out, ref, atol=5e-3, rtol=5e-3), "folded f32 mismatch"

    # 2) factored 2-matmul kernel path (used for very wide C).
    out_fac = jax.block_until_ready(
        pia_adapter_ffn(x, params, scale=scale, t=t, fold_hidden=False))
    assert jnp.allclose(out_fac, ref, atol=5e-3, rtol=5e-3), "factored mismatch"

    # 3) bf16 I/O (bandwidth-optimized path: halved HBM read+write bytes).
    xb = x.astype(jnp.bfloat16)
    out_bf = jax.block_until_ready(pia_adapter_ffn(xb, params, scale=scale, t=t))
    assert out_bf.dtype == jnp.bfloat16
    assert jnp.allclose(out_bf.astype(jnp.float32), ref, atol=5e-2, rtol=5e-2), \
        "bf16 mismatch"

    # 4) ragged L with a fixed 8-row tile: exercises the cdiv grid + Pallas
    #    boundary masking (no divisor-of-L requirement anymore).
    Lr = 12
    xr = jax.random.normal(jax.random.PRNGKey(1), (B, Lr, in_features),
                           jnp.float32)
    out_r = jax.block_until_ready(
        pia_adapter_ffn(xr, params, scale=scale, t=t, tile_l=8))
    ref_r = reference(xr, params, scale, t)
    assert jnp.allclose(out_r, ref_r, atol=5e-3, rtol=5e-3), "ragged-L mismatch"

    print("KERNEL_OK")
</pallas_src>

<mosaic_0001>
module attributes {stable_mosaic.version = 11 : i64} {
  func.func @_adapter_kernel_folded(%arg0: i32, %arg1: i32, %arg2: memref<1x16x128xf32, #tpu.memory_space<vmem>>, %arg3: memref<1x128x128xf32, #tpu.memory_space<vmem>>, %arg4: memref<1x1x128xf32, #tpu.memory_space<vmem>>, %arg5: memref<1x16x128xf32, #tpu.memory_space<vmem>>) attributes {dimension_semantics = [#tpu.dimension_semantics<parallel>, #tpu.dimension_semantics<parallel>], iteration_bounds = array<i64: 2, 1>, scalar_prefetch = 0 : i64, scratch_operands = 0 : i64, tpu.core_type = #tpu.core_type<tc>, window_params = [{transform_indices = @transform_0, window_bounds = array<i64: 1, 16, 128>}, {transform_indices = @transform_1, window_bounds = array<i64: 1, 128, 128>}, {transform_indices = @transform_2, window_bounds = array<i64: 1, 1, 128>}, {transform_indices = @transform_3, window_bounds = array<i64: 1, 16, 128>}]} {
    %c0 = arith.constant 0 : index
    %c0_0 = arith.constant 0 : index
    %c0_1 = arith.constant 0 : index
    %0 = vector.load %arg2[%c0, %c0_0, %c0_1] : memref<1x16x128xf32, #tpu.memory_space<vmem>>, vector<1x16x128xf32>
    %1 = vector.shape_cast %0 : vector<1x16x128xf32> to vector<16x128xf32>
    %c0_2 = arith.constant 0 : index
    %c0_3 = arith.constant 0 : index
    %c0_4 = arith.constant 0 : index
    %2 = vector.load %arg3[%c0_2, %c0_3, %c0_4] : memref<1x128x128xf32, #tpu.memory_space<vmem>>, vector<1x128x128xf32>
    %3 = vector.shape_cast %2 : vector<1x128x128xf32> to vector<128x128xf32>
    %cst = arith.constant dense<0.000000e+00> : vector<16x128xf32>
    %4 = tpu.matmul %1, %3, %cst {dimension_numbers = #tpu.dot_dimension_numbers<[1], [0], [0], [1], [0, 0, 1, 1], [], []>} : vector<16x128xf32>, vector<128x128xf32>, vector<16x128xf32> -> vector<16x128xf32>
    %c0_5 = arith.constant 0 : index
    %c0_6 = arith.constant 0 : index
    %c0_7 = arith.constant 0 : index
    %5 = vector.load %arg4[%c0_5, %c0_6, %c0_7] : memref<1x1x128xf32, #tpu.memory_space<vmem>>, vector<1x1x128xf32>
    %6 = vector.shape_cast %5 : vector<1x1x128xf32> to vector<1x128xf32>
    %7 = vector.broadcast %6 : vector<1x128xf32> to vector<16x128xf32>
    %8 = arith.addf %4, %7 : vector<16x128xf32>
    %9 = arith.addf %8, %1 : vector<16x128xf32>
    %c0_8 = arith.constant 0 : index
    %c0_9 = arith.constant 0 : index
    %c0_10 = arith.constant 0 : index
    %10 = vector.load %arg5[%c0_8, %c0_9, %c0_10] : memref<1x16x128xf32, #tpu.memory_space<vmem>>, vector<1x16x128xf32>
    %11 = vector.shape_cast %10 : vector<1x16x128xf32> to vector<16x128xf32>
    %12 = vector.shape_cast %9 : vector<16x128xf32> to vector<1x16x128xf32>
    tpu.vector_store %arg5[%c0_8, %c0_9, %c0_10], %12 {strides = array<i32>} : memref<1x16x128xf32, #tpu.memory_space<vmem>>, vector<1x16x128xf32>,
    return
  }
  func.func @transform_0(%arg0: i32, %arg1: i32) -> (i32, i32, i32) {
    %c0_i32 = arith.constant 0 : i32
    %c0_i32_0 = arith.constant 0 : i32
    return %arg0, %arg1, %c0_i32 : i32, i32, i32
  }
  func.func @transform_1(%arg0: i32, %arg1: i32) -> (i32, i32, i32) {
    %c0_i32 = arith.constant 0 : i32
    %c0_i32_0 = arith.constant 0 : i32
    %c0_i32_1 = arith.constant 0 : i32
    return %arg0, %c0_i32, %c0_i32_0 : i32, i32, i32
  }
  func.func @transform_2(%arg0: i32, %arg1: i32) -> (i32, i32, i32) {
    %c0_i32 = arith.constant 0 : i32
    %c0_i32_0 = arith.constant 0 : i32
    %c0_i32_1 = arith.constant 0 : i32
    return %arg0, %c0_i32, %c0_i32_0 : i32, i32, i32
  }
  func.func @transform_3(%arg0: i32, %arg1: i32) -> (i32, i32, i32) {
    %c0_i32 = arith.constant 0 : i32
    %c0_i32_0 = arith.constant 0 : i32
    return %arg0, %arg1, %c0_i32 : i32, i32, i32
  }
}

</mosaic_0001>

<bundles_post_ra>
// kernel: tpu_custom_call.1
= control target key start
LH: loop header
LB: loop body
LE: loop exit
PB: predicated region body
PF: predicated region fallthrough
CT: control target
= control target key end

     0   :  { %s1025_s0 = inlined_call_operand.hbm [shape: f32[2,16,128], index: 0, kind: input, shape index: {}]   ;;  %s1026_s1 = inlined_call_operand.hbm [shape: f32[2,128,128], index: 1, kind: input, shape index: {}]   ;;  %s1027_s2 = inlined_call_operand.vmem [shape: f32[2,1,128], index: 2, kind: input, shape index: {}]   ;;  %s1028_s3 = inlined_call_operand.hbm [shape: f32[2,16,128], index: 3, kind: output, shape index: {}]  }
   0x1   :  { %1029 = sst [smem:[#allocation11_spill]] %s1025_s0 }
   0x2   :  { %8 = vsyncpa [#allocation3], 0 }
   0x3   :  { %10 = vsyncpa [#allocation3 + $0x1], 0 }
   0x4   :  { %11 = vsyncpa [#allocation6], 0 }
   0x5   :  { %13 = vsyncpa [#allocation6 + $0x1], 0 }
   0x6   :  { %14 = vsyncpa [#allocation4], 0 }
   0x7   :  { %16 = vsyncpa [#allocation4 + $0x1], 0  ;;  %s818_s12 = smov 0   ;;  %s820_s13 = smov 0  }
   0x8   :  { %s822_s14 = smov 0   ;;  %s824_s15 = smov 0  }
   0x9   :  { %s826_s16 = smov 0   ;;  %s828_s17 = smov 0  }
   0xa LB: > { %s502_s18 = sadd.s32 4294967295, %s789_s17   ;;  %s503_s19 = sadd.s32 4294967294, %s789_s17   ;;  %s789_s17 = sphi %s828_s17, %s22_s17   ;;  %s785_s16 = sphi %s826_s16, %s1041_s16   ;;  %s781_s15 = sphi %s824_s15, %s1040_s15   ;;  %s777_s14 = sphi %s822_s14, %s1039_s14   ;;  %s773_s13 = sphi %s820_s13, %s1038_s13   ;;  %s769_s12 = sphi %s818_s12, %s1037_s12  }
   0xb   : > { %s34_s20 = sadd.s32 1, %s785_s16  ;;  %s43_s21 = sadd.s32 1, %s777_s14 }
   0xc   : > { %p36_p0 = scmp.ge.s32.totalorder %s34_s20, 2  ;;  %p50_p1 = scmp.ne.s32.totalorder %s777_s14, %s773_s13 }
   0xd   : > { %p51_p2 = scmp.eq.s32.totalorder %s789_s17, 0  ;;  %p56_p3 = scmp.ne.s32.totalorder %s773_s13, %s769_s12 }
   0xe   : > { %s1043_s20 = smov (%p36_p0, %s34_s20), 0  ;;  %p57_p5 = scmp.eq.s32.totalorder %s502_s18, 0 }
   0xf   : > { %p859_p4 = por %p51_p2, %p50_p1  ;;  %s38_s23 = ssub.s32 %s785_s16, %s1043_s20 }
  0x10   : > { %p134_p6 = scmp.eq.s32.totalorder %s502_s18, 1  ;;  %p41_p7 = scmp.eq.s32.totalorder %s38_s23, 0 }
  0x11   : > { %p865_p8 = por %p57_p5, %p56_p3  ;;  %p140_p10 = scmp.eq.s32.totalorder %s503_s19, 1 }
  0x12   : > { %p869_p9 = por %p134_p6, %p50_p1  ;;  %p505_p12 = scmp.ge.s32.totalorder %s789_s17, 2 }
  0x13   : > { %s874_s26 = scalar_select %p41_p7, %s777_s14, %s43_s21  }
  0x14   : > { %p876_p11 = por %p140_p10, %p56_p3  ;;  %p595_p13 = scmp.lt.s32.totalorder %s789_s17, 2 }
  0x15   : > { %s883_s28 = sand.u32 1, %s777_s14   ;;  %s522_s30 = sshll.u32 %s785_s16, 8 }
  0x16   : > { %s506_s29 = sshll.u32 %s883_s28, 4  ;;  %s1034_s0 = sld [smem:[#allocation11_spill]] }
  0x17   : > { %s164_s7 = scalar_lea.vmem [#allocation2], %s506_s29  ;;  %p892_p0 = pnand %p595_p13, %p859_p4 }
  0x18   : > { %s173_s8 = sshll.u32 %s164_s7, 4  ;;  %p512_p1 = scmp.ge.s32.totalorder %s789_s17, 1  ;;  %s174_s8 = int_to_ptr.vmem [resolvable:$true] %s173_s8 }
  0x19   : > { %s161_s10 = scalar_lea.sflag [#allocation3], %s883_s28  ;;  %p651_p2 = pneg %p892_p0 }
  0x1a   : > { %s662_s11 = scalar_lea.vmem %s174_s8, 256  ;;  %s791_s18 = smov [#allocation2]  }
  0x1b   : > { %p663_p3 = scmp.ne.s32.totalorder %s174_s8, %s662_s11  ;;  %s667_s19 = sshll.u32 %s791_s18, 4  ;;  %s668_s19 = int_to_ptr.vmem [resolvable:$false] %s667_s19 }
  0x1c   : > { %s172_s6 = scalar_lea.hbm %s1034_s0, %s522_s30  ;;  %s669_s21 = scalar_lea.vmem %s668_s19, 512 }
  0x1d   : > { %p665_p5 = pnand %p663_p3, %p651_p2  ;;  %p670_p4 = scmp.lt.s32.totalorder %s174_s8, %s668_s19 }
  0x1e   : > { %p671_p7 = scmp.lt.s32.totalorder %s669_s21, %s662_s11 }
  0x1f   : > { %p666_p6 = pneg %p665_p5 }
  0x20   : > { %p672_p10 = por %p671_p7, %p670_p4 }
  0x22   : > { %p673_p13 = pnand %p672_p10, %p666_p6 }
  0x24   : > { %676 = shalt.err (!%p673_p13)
}
  0x25   : > { %s792_s22 = smov 128   ;;  %s793_s23 = smov 8  }
  0x26   : > { %587 = dma.hbm_to_vmem [thread:$0]  (!%p892_p0), %s172_s6, 256, %s174_s8, %s161_s10, %s792_s22, %s792_s22, %s793_s23  }
  0x27   : > { %p208_p3 = scmp.lt.s32.totalorder %s789_s17, 3  ;;  %s509_s29 = sshll.u32 %s883_s28, 7 }
  0x28   : > { %s523_s30 = sshll.u32 %s785_s16, 11  ;;  %s187_s18 = scalar_lea.vmem [#allocation5], %s509_s29 }
  0x29   : > { %p910_p5 = pnand %p512_p1, %p208_p3  ;;  %s193_s11 = scalar_lea.hbm %s1026_s1, %s523_s30 }
  0x2a   : > { %s194_s19 = sshll.u32 %s187_s18, 4  ;;  %s184_s21 = scalar_lea.sflag [#allocation6], %s883_s28  ;;  %s195_s19 = int_to_ptr.vmem [resolvable:$true] %s194_s19 }
  0x2b   : > { %s690_s0 = scalar_lea.vmem %s195_s19, 2048  ;;  %s794_s6 = smov [#allocation5]  }
  0x2c   : > { %p691_p6 = scmp.ne.s32.totalorder %s195_s19, %s690_s0  ;;  %s695_s8 = sshll.u32 %s794_s6, 4  ;;  %s696_s8 = int_to_ptr.vmem [resolvable:$false] %s695_s8 }
  0x2d   : > { %s697_s10 = scalar_lea.vmem %s696_s8, 4096  ;;  %p698_p1 = scmp.lt.s32.totalorder %s195_s19, %s696_s8 }
  0x2e   : > { %p693_p4 = pnand %p691_p6, %p651_p2  ;;  %p699_p10 = scmp.lt.s32.totalorder %s697_s10, %s690_s0 }
  0x30   : > { %p694_p7 = pneg %p693_p4  ;;  %p700_p13 = por %p699_p10, %p698_p1 }
  0x32   : > { %p701_p3 = pnand %p700_p13, %p694_p7 }
  0x34   : > { %704 = shalt.err (!%p701_p3)
}
  0x35   : > { %590 = dma.hbm_to_vmem [thread:$0]  (!%p892_p0), %s193_s11, 2048, %s195_s19, %s184_s21, %s792_s22, %s792_s22, %s793_s23  }
  0x36   : > { %212 = sbr.rel (%p910_p5) target bundleno = 309 (0x135), region = 32  ;;  %s926_s28 = sand.u32 (!%p910_p5), 1, %s773_s13  }
  0x37   : > { %s513_s29 = sshll.u32 (!%p910_p5), %s926_s28, 4  ;;  %s215_s30 = scalar_lea.sflag (!%p910_p5), [#allocation3], %s926_s28 }
  0x38   : > { %s932_s0 = scalar_lea.vmem (!%p910_p5), [#allocation2], %s513_s29 }
  0x3b   : > { %756 = dma.done.wait (%p865_p8), %s215_s30, 256  }
  0x3c   : > { %758 = vsyncadd (%p865_p8), %s215_s30, 4294967040  ;;  %s514_s9 = sshll.u32 %s926_s28, 7  ;;  %s224_s22 = scalar_lea.sflag [#allocation6], %s926_s28 }
  0x3d   : > { %s940_s23 = scalar_lea.vmem [#allocation5], %s514_s9 }
  0x3e   : > { %760 = dma.done.wait (%p865_p8), %s224_s22, 2048  }
  0x3f   : > { %762 = vsyncadd (%p865_p8), %s224_s22, 4294965248  ;;  %v280_v0 = vld [vmem:[%s940_s23 + $0x78] sm:$0xff]  ;;  %v279_v1 = vld [vmem:[%s940_s23 + $0x70] sm:$0xff]  ;;  %p259_p8 = scmp.lt.s32.totalorder %s781_s15, 1  ;;  %s257_s11 = scalar_lea.vmem [#allocation7], %s513_s29 }
  0x40   : > { %543 = vmatprep.subr.mxu0 %v280_v0  ;;  %v278_v2 = vld [vmem:[%s940_s23 + $0x68] sm:$0xff]  ;;  %v277_v3 = vld [vmem:[%s940_s23 + $0x60] sm:$0xff]  ;;  %v276_v5 = vld [vmem:[%s940_s23 + $0x58] sm:$0xff]  ;;  %s383_s18 = sshll.u32 %s257_s11, 4  ;;  %s524_s19 = sshll.u32 %s781_s15, 8  ;;  %s972_s18 = int_to_ptr.vmem [resolvable:$true] %s383_s18 }
  0x41   : > { %544 = vmatpush3.msra.mxu0 %v280_v0  ;;  %v263_v4 = vld [vmem:[%s932_s0] sm:$0xff]  ;;  %v274_v7 = vld [vmem:[%s940_s23 + $0x48] sm:$0xff]  ;;  %v272_v9 = vld [vmem:[%s940_s23 + $0x38] sm:$0xff]  ;;  %s260_s24 = scalar_select %p259_p8, %s781_s15, 1 }
  0x42   : > { %545 = vmatprep.subr.mxu0 %v279_v1  ;;  %575 = vmatprep.mubr.f32.mxu0 %v263_v4  ;;  %v275_v6 = vld [vmem:[%s940_s23 + $0x50] sm:$0xff]  ;;  %v273_v8 = vld [vmem:[%s940_s23 + $0x40] sm:$0xff]  ;;  %v270_v11 = vld [vmem:[%s940_s23 + $0x28] sm:$0xff]  ;;  %s977_s8 = scalar_lea.hbm %s1028_s3, %s524_s19  ;;  %s368_s10 = scalar_lea.sflag [#allocation4], %s926_s28 }
  0x43   : > { %546 = vmatpush3.msra.mxu0 %v279_v1  ;;  %v271_v10 = vld [vmem:[%s940_s23 + $0x30] sm:$0xff]  ;;  %v269_v12 = vld [vmem:[%s940_s23 + $0x20] sm:$0xff]  ;;  %v268_v13 = vld [vmem:[%s940_s23 + $0x18] sm:$0xff]  ;;  %s261_s7 = scalar_lea.vmem %s1027_s2, %s260_s24  ;;  %s705_s29 = scalar_lea.vmem %s972_s18, 256 }
  0x44   : > { %547 = vmatprep.subr.mxu0 %v278_v2  ;;  %v267_v14 = vld [vmem:[%s940_s23 + $0x10] sm:$0xff]  ;;  %v266_v15 = vld [vmem:[%s940_s23 + $0x8] sm:$0xff]  ;;  %v265_v16 = vld [vmem:[%s940_s23] sm:$0xff]  ;;  %p706_p0 = scmp.ne.s32.totalorder %s972_s18, %s705_s29  ;;  %s795_s15 = smov [#allocation7]  }
  0x45   : > { %548 = vmatpush3.msra.mxu0 %v278_v2  ;;  %v264_v17 = vld [vmem:[%s932_s0 + $0x8] sm:$0xff]  ;;  %v516_v18 = vld [vmem:[%s261_s7] ss:$0 sm:$0xff]  ;;  %s709_s30 = sshll.u32 %s795_s15, 4  ;;  %s710_s30 = int_to_ptr.vmem [resolvable:$false] %s709_s30 }
  0x46   : > { %549 = vmatprep.subr.mxu0 %v277_v3  ;;  %p707_p2 = pnand %p706_p0, %p869_p9  ;;  %s711_s0 = scalar_lea.vmem %s710_s30, 512 }
  0x47   : > { %550 = vmatpush3.msra.mxu0 %v277_v3  ;;  %p712_p6 = scmp.lt.s32.totalorder %s972_s18, %s710_s30  ;;  %p713_p4 = scmp.lt.s32.totalorder %s711_s0, %s705_s29 }
  0x48   : > { %551 = vmatprep.subr.mxu0 %v276_v5  ;;  %p708_p5 = pneg %p707_p2 }
  0x49   : > { %552 = vmatpush3.msra.mxu0 %v276_v5  ;;  %p714_p7 = por %p713_p4, %p712_p6 }
  0x4a   : > { %553 = vmatprep.subr.mxu0 %v275_v6 }
  0x4b   : > { %554 = vmatpush3.msra.mxu0 %v275_v6  ;;  %p715_p1 = pnand %p714_p7, %p708_p5 }
  0x4c   : > { %555 = vmatprep.subr.mxu0 %v274_v7 }
  0x4d   : > { %556 = vmatpush3.msra.mxu0 %v274_v7 }
  0x4e   : > { %557 = vmatprep.subr.mxu0 %v273_v8 }
  0x4f   : > { %558 = vmatpush3.msra.mxu0 %v273_v8 }
  0x50   : > { %559 = vmatprep.subr.mxu0 %v272_v9 }
  0x51   : > { %560 = vmatpush3.msra.mxu0 %v272_v9 }
  0x52   : > { %561 = vmatprep.subr.mxu0 %v271_v10 }
  0x53   : > { %562 = vmatpush3.msra.mxu0 %v271_v10 }
  0x54   : > { %563 = vmatprep.subr.mxu0 %v270_v11 }
  0x55   : > { %564 = vmatpush3.msra.mxu0 %v270_v11 }
  0x56   : > { %565 = vmatprep.subr.mxu0 %v269_v12 }
  0x57   : > { %566 = vmatpush3.msra.mxu0 %v269_v12 }
  0x58   : > { %567 = vmatprep.subr.mxu0 %v268_v13 }
  0x59   : > { %568 = vmatpush3.msra.mxu0 %v268_v13 }
  0x5a   : > { %569 = vmatprep.subr.mxu0 %v267_v14 }
  0x5b   : > { %570 = vmatpush3.msra.mxu0 %v267_v14 }
  0x5c   : > { %571 = vmatprep.subr.mxu0 %v266_v15 }
  0x5d   : > { %572 = vmatpush3.msra.mxu0 %v266_v15 }
  0x5e   : > { %573 = vmatprep.subr.mxu0 %v265_v16 }
  0x5f   : > { %574 = vmatpush3.msra.mxu0 %v265_v16 }
  0x60   : > { %576 = vmatmul.mubr.f32.vlgmr.msra.gmra.mxu0 %v264_v17 }
 0x120   : > { %v577_v19 = vpop.f32.mrf.mxu0 }
 0x121   : > { %v360_v20 = vadd.f32 %v577_v19, %v516_v18 }
 0x122   : > { %v354_v21 = vpop.f32.mrf.mxu0 }
 0x123   : > { %v364_v22 = vadd.f32 %v360_v20, %v264_v17  ;;  %v355_v23 = vadd.f32 %v516_v18, %v354_v21 }
 0x125   : > { %366 = vst [vmem:[%s257_s11 + $0x8] sm:$0xff] %v364_v22  ;;  %v363_v24 = vadd.f32 %v355_v23, %v263_v4 }
 0x127   : > { %365 = vst [vmem:[%s257_s11] sm:$0xff] %v363_v24 }
 0x128   : > { %718 = shalt.err (!%p715_p1)
}
 0x129   : > { %s719_s9 = scalar_lea.hbm %s977_s8, 256  ;;  %s723_s24 = scalar_lea.hbm %s1028_s3, 512 }
 0x12a   : > { %p720_p10 = scmp.ne.s32.totalorder %s977_s8, %s719_s9  ;;  %p724_p8 = scmp.lt.s32.totalorder %s977_s8, %s1028_s3 }
 0x12b   : > { %p725_p0 = scmp.lt.s32.totalorder %s723_s24, %s719_s9 }
 0x12c   : > { %p721_p13 = pnand %p720_p10, %p869_p9 }
 0x12d   : > { %p726_p2 = por %p725_p0, %p724_p8 }
 0x12e   : > { %p722_p3 = pneg %p721_p13 }
 0x130   : > { %p727_p5 = pnand %p726_p2, %p722_p3 }
 0x132   : > { %730 = shalt.err (!%p727_p5)
}
 0x133   : > { %s796_s7 = smov 128   ;;  %s797_s11 = smov 8  }
 0x134   : > { %582 = dma.vmem_to_hbm [thread:$0]  (%p869_p9), %s972_s18, 256, %s977_s8, %s368_s10, %s796_s7, %s796_s7, %s797_s11  }
 0x135 PF: > { %s398_s19 = sand.u32 1, %s769_s12   ;;  %p592_p6 = pnand %p505_p12, %p876_p11 }
 0x136   : > { %s399_s21 = scalar_lea.sflag [#allocation4], %s398_s19 }
 0x137   : > { %p593_p4 = pneg %p592_p6 }
 0x139   : > { %764 = dma.done.wait (%p593_p4), %s399_s21, 256  }
 0x13a   : > { %766 = vsyncadd (%p593_p4), %s399_s21, 4294967040  ;;  %s22_s17 = sadd.s32 1, %s789_s17   ;;  %s1037_s12 = smov %s773_s13 }
 0x13b   : > { %p19_p7 = scmp.ge.s32.totalorder %s22_s17, 4   ;;  %s1038_s13 = smov %s777_s14 }
 0x13c   : > { %s1039_s14 = smov %s874_s26  ;;  %s1040_s15 = smov %s785_s16 }
 0x13d   : > { %s1041_s16 = smov %s1043_s20  ;;  %21 = sbr.rel (!%p19_p7) target bundleno = 10 (0xa), region = 93 }
 0x142   :  { %404 = vsyncpa [#allocation3], 1 }
 0x143   :  { %406 = vsyncpa [#allocation3 + $0x1], 1 }
 0x144   :  { %407 = vsyncpa [#allocation6], 1 }
 0x145   :  { %409 = vsyncpa [#allocation6 + $0x1], 1 }
 0x146   :  { %410 = vsyncpa [#allocation4], 1 }
 0x147   :  { %412 = vsyncpa [#allocation4 + $0x1], 1 }

</bundles_post_ra>
